<compile_context>
chip_gen: v7x
topology: tpu7x:2x2x1
jax: 0.10.0
libtpu: 0.0.40
codegen_flags: <defaults>
</compile_context>

<pallas_src>
import jax
import jax.numpy as jnp
from jax.experimental import pallas as pl
from jax.experimental.pallas import tpu as pltpu

FREQ_MAP = {'h': 4, 't': 5, 's': 6, 'm': 1, 'a': 1, 'w': 2, 'd': 3, 'b': 3}

_LANE = 128
_SUBLANE = 8
_TARGET_TILE_M = 4096     # packed rows per grid step (~2 MiB output tile)
_MIN_PALLAS_ROWS = 2048   # below this, let XLA run / fuse the tiny contraction


def _round_up(n: int, m: int) -> int:
    return ((n + m - 1) // m) * m


def _rowpack_linear_kernel(xp_ref, wbd_ref, o_ref):
    # xp_ref : (tile_m, pack*d_inp)  row-packed activations (free reshape of (N, d_inp))
    # wbd_ref: (pack*d_inp, pack*E)  block-diagonal weight kron(I_pack, W.T), resident
    # o_ref  : (tile_m, pack*E)      row-packed output; bit-identical to natural (N, E)
    o_ref[...] = jnp.dot(
        xp_ref[...], wbd_ref[...], preferred_element_type=jnp.float32
    ).astype(o_ref.dtype)


def time_feature_embedding(x, weight, *, min_pallas_rows: int = _MIN_PALLAS_ROWS):
    """Forward of TimeFeatureEmbedding: y = x @ W.T (bias-free Linear).

    x      : (B, L, d_inp) float32
    weight : (E, d_inp)    float32 (PyTorch nn.Linear layout)
    returns: (B, L, E)     float32
    """
    B, L, d_inp = x.shape
    E, d_inp_w = weight.shape
    assert d_inp == d_inp_w

    N = B * L
    if N < min_pallas_rows:
        # Tiny problems: custom-call launch overhead + lost fusion dominate; let XLA do it.
        return jnp.einsum("bld,ed->ble", x, weight)

    # Row-packing factor: pack rows so the output lane axis is 128-wide (unmasked vst).
    pack = _LANE // E if (E <= _LANE and _LANE % E == 0) else 1

    x_flat = x.reshape(N, d_inp)
    n_pad = _round_up(N, pack)
    if n_pad != N:
        # Tiny pad (< pack rows) so the row-pack reshape is exact; sliced off below.
        x_flat = jnp.pad(x_flat, ((0, n_pad - N), (0, 0)))
    n_packed = n_pad // pack

    # Free, row-major reshape: `pack` consecutive (d_inp,)-rows -> one (pack*d_inp,)-row.
    x_packed = x_flat.reshape(n_packed, pack * d_inp)
    # Block-diagonal weight with W.T on the diagonal: (pack*d_inp, pack*E).
    wbd = jnp.kron(jnp.eye(pack, dtype=weight.dtype), weight.T)

    # Tile selection: big tiles to amortize per-step overhead, but keep >= 2 grid steps
    # (megacore sharding on v7x) whenever the problem is large enough to split.
    if n_packed <= 2 * _SUBLANE:
        tile_m = n_packed                                   # full extent (always valid)
    else:
        half = _round_up(-(-n_packed // 2), _SUBLANE)       # ceil(n/2), sublane-aligned
        tile_m = min(_TARGET_TILE_M, half)
    grid = (pl.cdiv(n_packed, tile_m),)

    out_packed = pl.pallas_call(
        _rowpack_linear_kernel,
        out_shape=jax.ShapeDtypeStruct((n_packed, pack * E), x.dtype),
        grid=grid,
        in_specs=[
            pl.BlockSpec((tile_m, pack * d_inp), lambda i: (i, 0)),    # activation tiles
            pl.BlockSpec((pack * d_inp, pack * E), lambda i: (0, 0)),  # weight, resident
        ],
        out_specs=pl.BlockSpec((tile_m, pack * E), lambda i: (i, 0)),
        compiler_params=pltpu.CompilerParams(
            dimension_semantics=("parallel",),
        ),
    )(x_packed, wbd)

    # Row-packed block layout == natural row-major layout: pure (free) reshape back.
    out = out_packed.reshape(n_pad, E)
    if n_pad != N:
        out = out[:N]
    return out.reshape(B, L, E)


if __name__ == "__main__":
    # Module config: embedding_size=32, freq='d' -> d_inp = 3
    embedding_size = 32
    freq = 'd'
    d_inp = FREQ_MAP[freq]

    key = jax.random.PRNGKey(0)
    k_w, k_x1, k_x2, k_x3 = jax.random.split(key, 4)

    # Deterministic parameter init (synthetic; PyTorch Linear shape: (E, d_inp))
    bound = 1.0 / (d_inp ** 0.5)
    weight = jax.random.uniform(
        k_w, (embedding_size, d_inp), dtype=jnp.float32, minval=-bound, maxval=bound
    )

    # 1) Small, module-scale shape; force the Pallas path so the kernel itself runs.
    batch, seq = 2, 8
    x_small = jax.random.normal(k_x1, (batch, seq, d_inp), dtype=jnp.float32)
    out_small = jax.block_until_ready(
        time_feature_embedding(x_small, weight, min_pallas_rows=0))
    ref_small = jnp.einsum("bld,ed->ble", x_small, weight)
    assert out_small.shape == (batch, seq, embedding_size)
    assert jnp.allclose(out_small, ref_small, atol=1e-5, rtol=1e-5)

    # 2) Odd row count (exercises pack-alignment pad + clipped boundary block).
    x_odd = jax.random.normal(k_x3, (3, 7, d_inp), dtype=jnp.float32)
    out_odd = jax.block_until_ready(
        time_feature_embedding(x_odd, weight, min_pallas_rows=0))
    ref_odd = jnp.einsum("bld,ed->ble", x_odd, weight)
    assert out_odd.shape == (3, 7, embedding_size)
    assert jnp.allclose(out_odd, ref_odd, atol=1e-5, rtol=1e-5)

    # 3) Larger shape through the default dispatch (Pallas path, >= 2 parallel grid steps).
    x_big = jax.random.normal(k_x2, (8, 512, d_inp), dtype=jnp.float32)
    out_big = jax.block_until_ready(time_feature_embedding(x_big, weight))
    ref_big = jnp.einsum("bld,ed->ble", x_big, weight)
    assert out_big.shape == (8, 512, embedding_size)
    assert jnp.allclose(out_big, ref_big, atol=1e-5, rtol=1e-5)

    print("KERNEL_OK")
</pallas_src>

<mosaic_0001>
module attributes {stable_mosaic.version = 11 : i64} {
  func.func @_rowpack_linear_kernel(%arg0: i32, %arg1: memref<4x12xf32, #tpu.memory_space<vmem>>, %arg2: memref<12x128xf32, #tpu.memory_space<vmem>>, %arg3: memref<4x128xf32, #tpu.memory_space<vmem>>) attributes {dimension_semantics = [#tpu.dimension_semantics<parallel>], iteration_bounds = array<i64: 1>, scalar_prefetch = 0 : i64, scratch_operands = 0 : i64, tpu.core_type = #tpu.core_type<tc>, window_params = [{transform_indices = @transform_0, window_bounds = array<i64: 4, 12>}, {pipeline_mode = #tpu.pipeline_mode<synchronous>, transform_indices = @transform_1, window_bounds = array<i64: 12, 128>}, {transform_indices = @transform_2, window_bounds = array<i64: 4, 128>}]} {
    %c0 = arith.constant 0 : index
    %c0_0 = arith.constant 0 : index
    %0 = vector.load %arg1[%c0, %c0_0] : memref<4x12xf32, #tpu.memory_space<vmem>>, vector<4x12xf32>
    %c0_1 = arith.constant 0 : index
    %c0_2 = arith.constant 0 : index
    %1 = vector.load %arg2[%c0_1, %c0_2] : memref<12x128xf32, #tpu.memory_space<vmem>>, vector<12x128xf32>
    %cst = arith.constant dense<0.000000e+00> : vector<4x128xf32>
    %2 = tpu.matmul %0, %1, %cst {dimension_numbers = #tpu.dot_dimension_numbers<[1], [0], [0], [1], [0, 0, 1, 1], [], []>} : vector<4x12xf32>, vector<12x128xf32>, vector<4x128xf32> -> vector<4x128xf32>
    %c0_3 = arith.constant 0 : index
    %c0_4 = arith.constant 0 : index
    %3 = vector.load %arg3[%c0_3, %c0_4] : memref<4x128xf32, #tpu.memory_space<vmem>>, vector<4x128xf32>
    tpu.vector_store %arg3[%c0_3, %c0_4], %2 {strides = array<i32>} : memref<4x128xf32, #tpu.memory_space<vmem>>, vector<4x128xf32>,
    return
  }
  func.func @transform_0(%arg0: i32) -> (i32, i32) {
    %c0_i32 = arith.constant 0 : i32
    %c0_i32_0 = arith.constant 0 : i32
    return %arg0, %c0_i32 : i32, i32
  }
  func.func @transform_1(%arg0: i32) -> (i32, i32) {
    %c0_i32 = arith.constant 0 : i32
    %c0_i32_0 = arith.constant 0 : i32
    %c0_i32_1 = arith.constant 0 : i32
    return %c0_i32, %c0_i32_0 : i32, i32
  }
  func.func @transform_2(%arg0: i32) -> (i32, i32) {
    %c0_i32 = arith.constant 0 : i32
    %c0_i32_0 = arith.constant 0 : i32
    return %arg0, %c0_i32 : i32, i32
  }
}

</mosaic_0001>

<bundles_post_ra>
// kernel: tpu_custom_call.1
= control target key start
LH: loop header
LB: loop body
LE: loop exit
PB: predicated region body
PF: predicated region fallthrough
CT: control target
= control target key end

     0   :  { %7 = vsyncpa [#allocation3], 0  ;;  %s300_s0 = inlined_call_operand.hbm [shape: f32[4,12], index: 0, kind: input, shape index: {}]   ;;  %s301_s1 = inlined_call_operand.hbm [shape: f32[12,128], index: 1, kind: input, shape index: {}]   ;;  %s302_s2 = inlined_call_operand.hbm [shape: f32[4,128], index: 2, kind: output, shape index: {}]  }
   0x1   :  { %8 = vsyncpa [#allocation6], 0 }
   0x2   :  { %9 = vsyncpa [#allocation4], 0  ;;  %s233_s9 = smov [#allocation2]   ;;  %s234_s11 = smov [#allocation5]  }
   0x3   :  { %s16_s10 = sshll.u32 %s233_s9, 4  ;;  %s25_s12 = sshll.u32 %s234_s11, 4  ;;  %s17_s10 = int_to_ptr.vmem [resolvable:$true] %s16_s10  ;;  %s257_s12 = int_to_ptr.vmem [resolvable:$true] %s25_s12 }
   0x4   :  { %s161_s15 = scalar_lea.hbm %s300_s0, 64 }
   0x5   :  { %p162_p0 = scmp.ne.s32.totalorder %s300_s0, %s161_s15  ;;  %p165_p1 = scmp.lt.u32.totalorder %s161_s15, %s300_s0 }
   0x7   :  { %p167_p2 = pnand %p165_p1, %p162_p0 }
   0x9   :  { %170 = shalt.err (!%p167_p2)
}
   0xa   :  { %s171_s20 = scalar_lea.vmem %s17_s10, 64  ;;  %p176_p4 = scmp.lt.s32.totalorder %s17_s10, %s17_s10 }
   0xb   :  { %p172_p3 = scmp.ne.s32.totalorder %s17_s10, %s171_s20  ;;  %p177_p5 = scmp.lt.s32.totalorder %s171_s20, %s171_s20 }
   0xd   :  { %p178_p6 = por %p177_p5, %p176_p4 }
   0xf   :  { %p179_p7 = pnand %p178_p6, %p172_p3 }
  0x11   :  { %182 = shalt.err (!%p179_p7)
}
  0x12   :  { %19 = dma.hbm_to_vmem [thread:$0]  %s300_s0, 64, %s17_s10, [#allocation3]  }
  0x13   :  { %s183_s25 = scalar_lea.hbm %s301_s1, 256 }
  0x14   :  { %p184_p8 = scmp.ne.s32.totalorder %s301_s1, %s183_s25  ;;  %p187_p9 = scmp.lt.u32.totalorder %s183_s25, %s301_s1 }
  0x16   :  { %p189_p10 = pnand %p187_p9, %p184_p8 }
  0x18   :  { %192 = shalt.err (!%p189_p10)
}
  0x19   :  { %s193_s30 = scalar_lea.vmem %s257_s12, 256  ;;  %p198_p12 = scmp.lt.s32.totalorder %s257_s12, %s257_s12 }
  0x1a   :  { %p194_p11 = scmp.ne.s32.totalorder %s257_s12, %s193_s30  ;;  %p199_p13 = scmp.lt.s32.totalorder %s193_s30, %s193_s30 }
  0x1c   :  { %p200_p0 = por %p199_p13, %p198_p12 }
  0x1e   :  { %p201_p1 = pnand %p200_p0, %p194_p11 }
  0x20   :  { %204 = shalt.err (!%p201_p1)
}
  0x21   :  { %s235_s0 = smov 128   ;;  %s236_s3 = smov 8  }
  0x22   :  { %31 = dma.hbm_to_vmem [thread:$0]  %s301_s1, 256, %s257_s12, [#allocation6], %s235_s0, %s235_s0, %s236_s3  }
  0x23   :  { %227 = dma.done.wait [#allocation3], 64  }
  0x24   :  { %228 = vsyncadd [#allocation3], 4294967232 }
  0x25   :  { %229 = dma.done.wait [#allocation6], 256  }
  0x26   :  { %230 = vsyncadd [#allocation6], 4294967040  ;;  %v237_v0 = vmov 0.0|0.0   ;;  %vm238_vm0 = vmmov 0   ;;  %v239_v1 = vmov 0.0   ;;  %vm45_vm1 = vcmask 1043456  }
  0x27   :  { %148 = vmatprep.subr.bf16.mxu0 %v237_v0  ;;  %145 = vmatprep.mubr.msk.f32.mxu0 %vm238_vm0, %v239_v1  ;;  %v39_v2 = vld [vmem:[#allocation5] sm:$0xff]  ;;  %v40_v3 = vld [vmem:[#allocation5 + $0x8] sm:$0xf]  ;;  %vm240_vm2 = vmmov 1   ;;  %v38_v5 = vld [vmem:[#allocation2] sm:$0xf] }
  0x28   :  { %vm150_vm3 = vmpackc.low %vm45_vm1, %vm240_vm2  ;;  %v149_v4 = vpack.c.bf16 %v40_v3, %v39_v2  ;;  %vm41_vm4 = vcmask 97280   ;;  %s241_s1 = smov [#allocation7]  }
  0x29   :  { %s126_s6 = sshll.u32 %s241_s1, 4  ;;  %s127_s6 = int_to_ptr.vmem [resolvable:$true] %s126_s6 }
  0x2a   :  { %151 = vmatpush3.bf16.msk.msra.mxu0 %vm150_vm3, %v149_v4  ;;  %s205_s7 = scalar_lea.vmem %s127_s6, 64  ;;  %p210_p3 = scmp.lt.s32.totalorder %s127_s6, %s127_s6 }
  0x2b   :  { %p206_p2 = scmp.ne.s32.totalorder %s127_s6, %s205_s7  ;;  %p211_p4 = scmp.lt.s32.totalorder %s205_s7, %s205_s7 }
  0x2d   :  { %146 = vmatmul.mubr.msk.f32.vlgmr.msra.gmra.mrb[0].mxu0 %vm41_vm4, %v38_v5  ;;  %p212_p5 = por %p211_p4, %p210_p3 }
  0x2f   :  { %p213_p6 = pnand %p212_p5, %p206_p2 }
 0x100   :  { %v115_v6 = vpop.f32.mrb[0].mxu0 }
 0x101   :  { %119 = vst [vmem:[#allocation7] sm:$0xf] %v115_v6  ;;  %v147_v7 = vpop.f32.mrb[1].mxu0 }
 0x102   :  { %216 = shalt.err (!%p213_p6)
}
 0x103   :  { %s217_s10 = scalar_lea.hbm %s302_s2, 64 }
 0x104   :  { %p218_p7 = scmp.ne.s32.totalorder %s302_s2, %s217_s10  ;;  %p221_p8 = scmp.lt.u32.totalorder %s217_s10, %s302_s2 }
 0x106   :  { %p223_p9 = pnand %p221_p8, %p218_p7 }
 0x108   :  { %226 = shalt.err (!%p223_p9)
}
 0x109   :  { %129 = dma.vmem_to_hbm [thread:$0]  %s127_s6, 64, %s302_s2, [#allocation4]  }
 0x10a   :  { %231 = dma.done.wait [#allocation4], 64  }
 0x10b   :  { %232 = vsyncadd [#allocation4], 4294967232 }
 0x10c   :  { %133 = vsyncpa [#allocation3], 1 }
 0x10d   :  { %134 = vsyncpa [#allocation6], 1 }
 0x10e   :  { %135 = vsyncpa [#allocation4], 1 }

</bundles_post_ra>
